<compile_context>
chip_gen: v7x
topology: tpu7x:2x2x1
jax: 0.10.0
libtpu: 0.0.40
codegen_flags: <defaults>
</compile_context>

<pallas_src>
import numpy as np

import jax
import jax.numpy as jnp
from jax.experimental import pallas as pl
from jax.experimental.pallas import tpu as pltpu


# ----------------------------------------------------------------------------
# One-time parameter fold: conv weight (OC,IC,KH,KW) -> unrolled matrix M with
#   x.reshape(N, IC*H*W) @ M == conv2d(x, w, stride, pad).reshape(N, OC*OH*OW)
# using NCHW row-major flattening on both sides (exactly torch's .view order).
# ----------------------------------------------------------------------------
def conv_unrolled_matrix(w, in_hw, stride, pad):
    wn = np.asarray(w, np.float32)
    OC, IC, KH, KW = wn.shape
    H, W = in_hw
    OH = (H + 2 * pad - KH) // stride + 1
    OW = (W + 2 * pad - KW) // stride + 1

    oc, ic, kh, kw, oh, ow = np.meshgrid(
        np.arange(OC), np.arange(IC), np.arange(KH), np.arange(KW),
        np.arange(OH), np.arange(OW), indexing="ij")
    ih = oh * stride + kh - pad
    iw = ow * stride + kw - pad
    valid = (ih >= 0) & (ih < H) & (iw >= 0) & (iw < W)
    oc, ic, kh, kw, oh, ow, ih, iw = (
        a[valid] for a in (oc, ic, kh, kw, oh, ow, ih, iw))

    rows = ic * (H * W) + ih * W + iw          # flattened NCHW input index
    cols = oc * (OH * OW) + oh * OW + ow       # flattened NCHW output index

    M = np.zeros((IC * H * W, OC * OH * OW), np.float32)
    M[rows, cols] = wn[oc, ic, kh, kw]
    return M, (OH, OW)


def fold_params(params, in_hw=(8, 8), dtype=jnp.bfloat16):
    """Hoisted out of the forward: run once per parameter point.

    Returns bf16 matmul operands; accumulation stays f32 inside the kernel.
    """
    w1, w2, w3 = params
    m1, hw1 = conv_unrolled_matrix(w1, in_hw, stride=2, pad=1)   # (192, 256)
    m2, hw2 = conv_unrolled_matrix(w2, hw1, stride=2, pad=1)     # (256, 128)
    feat = int(w2.shape[0]) * hw2[0] * hw2[1]
    # torch's y.view(-1, 128) maps one row per sample only when this holds.
    assert feat == int(w3.shape[1]), (
        f"conv2 output has {feat} elems/sample, expected {int(w3.shape[1])}")
    m3 = np.asarray(w3, np.float32).T                            # (128, 2)
    return (jnp.asarray(m1, dtype), jnp.asarray(m2, dtype),
            jnp.asarray(m3, dtype))


# ----------------------------------------------------------------------------
# Fused Pallas kernel: three MXU matmuls (bf16 operands, f32 accumulate) with
# f32 ReLU epilogues.  Activations stay in vregs/VMEM for the whole forward.
# ----------------------------------------------------------------------------
def _fcnet_fused_kernel(x_ref, w1_ref, w2_ref, w3_ref, o_ref):
    y1 = jnp.dot(x_ref[...], w1_ref[...],
                 preferred_element_type=jnp.float32)             # (bm, 256) f32
    y1 = jnp.maximum(y1, 0.0).astype(jnp.bfloat16)
    y2 = jnp.dot(y1, w2_ref[...],
                 preferred_element_type=jnp.float32)             # (bm, 128) f32
    y2 = jnp.maximum(y2, 0.0).astype(jnp.bfloat16)
    o_ref[...] = jnp.dot(y2, w3_ref[...],
                         preferred_element_type=jnp.float32
                         ).astype(o_ref.dtype)                   # (bm, 2)


# ----------------------------------------------------------------------------
# Batch tiling helper: never let the tile degenerate to the whole batch.
# ----------------------------------------------------------------------------
def _round_up(x, m):
    return ((x + m - 1) // m) * m


def _choose_batch_tile(n, block_m):
    """Sublane-aligned batch tile and zero-padded batch size."""
    if n >= 2 * block_m:
        bm = block_m
    elif n > 8:
        # Split mid-size batches into >= 2 tiles so ("parallel",) puts work
        # on both v7x TensorCores (no-op on single-TC v5e/v6e).
        bm = _round_up(pl.cdiv(n, 2), 8)
    else:
        bm = 8
    return bm, _round_up(n, bm)


_VMEM_LIMIT_BYTES = 32 << 20   # fits v5e/v6e/v7x budgets at bm <= ~4096 bf16/f32


def fcnet_forward(x, folded_params, *, block_m=2048):
    """x: (N, 3, 8, 8) NCHW float32; folded_params from fold_params()."""
    w1m, w2m, w3m = folded_params
    N = x.shape[0]
    k_in = w1m.shape[0]
    n_out = w3m.shape[1]

    xf = x.reshape(N, k_in).astype(jnp.bfloat16)   # NCHW flatten, bf16 once
    bm, n_pad = _choose_batch_tile(N, block_m)
    if n_pad != N:
        xf = jnp.pad(xf, ((0, n_pad - N), (0, 0)))
    grid = (n_pad // bm,)

    out = pl.pallas_call(
        _fcnet_fused_kernel,
        out_shape=jax.ShapeDtypeStruct((n_pad, n_out), jnp.float32),
        grid=grid,
        in_specs=[
            pl.BlockSpec((bm, k_in), lambda i: (i, 0)),
            pl.BlockSpec(w1m.shape, lambda i: (0, 0)),
            pl.BlockSpec(w2m.shape, lambda i: (0, 0)),
            pl.BlockSpec(w3m.shape, lambda i: (0, 0)),
        ],
        out_specs=pl.BlockSpec((bm, n_out), lambda i: (i, 0)),
        compiler_params=pltpu.CompilerParams(
            dimension_semantics=("parallel",),
            vmem_limit_bytes=_VMEM_LIMIT_BYTES),
    )(xf, w1m, w2m, w3m)
    return out[:N] if n_pad != N else out


def fcnet_forward_points(x, folded_stack, *, block_m=2048):
    """Loss-landscape sweep: evaluate P folded parameter points in one call.

    x:            (N, 3, 8, 8) NCHW float32
    folded_stack: (W1s, W2s, W3s) of shapes (P,192,256), (P,256,128), (P,128,2)
    returns:      (P, N, 2) float32
    """
    w1s, w2s, w3s = folded_stack
    P = w1s.shape[0]
    N = x.shape[0]
    k_in = w1s.shape[1]
    n_out = w3s.shape[2]

    xf = x.reshape(N, k_in).astype(jnp.bfloat16)
    bm, n_pad = _choose_batch_tile(N, block_m)
    if n_pad != N:
        xf = jnp.pad(xf, ((0, n_pad - N), (0, 0)))

    out = pl.pallas_call(
        _fcnet_fused_kernel,
        out_shape=jax.ShapeDtypeStruct((P, n_pad, n_out), jnp.float32),
        grid=(P, n_pad // bm),
        in_specs=[
            pl.BlockSpec((bm, k_in), lambda p, i: (i, 0)),
            pl.BlockSpec((None,) + tuple(w1s.shape[1:]), lambda p, i: (p, 0, 0)),
            pl.BlockSpec((None,) + tuple(w2s.shape[1:]), lambda p, i: (p, 0, 0)),
            pl.BlockSpec((None,) + tuple(w3s.shape[1:]), lambda p, i: (p, 0, 0)),
        ],
        out_specs=pl.BlockSpec((None, bm, n_out), lambda p, i: (p, i, 0)),
        compiler_params=pltpu.CompilerParams(
            dimension_semantics=("parallel", "parallel"),
            vmem_limit_bytes=_VMEM_LIMIT_BYTES),
    )(xf, w1s, w2s, w3s)
    return out[:, :N, :] if n_pad != N else out


# ----------------------------------------------------------------------------
# Reference (pure JAX) forward for a correctness self-check.
# ----------------------------------------------------------------------------
def reference_forward(x, params):
    w1, w2, w3 = params
    y = jax.lax.conv_general_dilated(
        x, w1, (2, 2), [(1, 1), (1, 1)],
        dimension_numbers=("NCHW", "OIHW", "NCHW"),
        precision=jax.lax.Precision.HIGHEST)
    y = jnp.maximum(y, 0.0)
    y = jax.lax.conv_general_dilated(
        y, w2, (2, 2), [(1, 1), (1, 1)],
        dimension_numbers=("NCHW", "OIHW", "NCHW"),
        precision=jax.lax.Precision.HIGHEST)
    y = jnp.maximum(y, 0.0)
    return y.reshape(-1, 128) @ w3.T


def init_params(key):
    k1, k2, k3 = jax.random.split(key, 3)

    def kaiming_uniform(k, shape, fan_in):
        bound = 1.0 / jnp.sqrt(jnp.float32(fan_in))
        return jax.random.uniform(k, shape, jnp.float32, -bound, bound)

    w1 = kaiming_uniform(k1, (16, 3, 3, 3), 3 * 3 * 3)      # Conv2d(3, 16, 3)
    w2 = kaiming_uniform(k2, (32, 16, 3, 3), 16 * 3 * 3)    # Conv2d(16, 32, 3)
    w3 = kaiming_uniform(k3, (2, 128), 128)                 # Linear(128, 2)
    return (w1, w2, w3)


if __name__ == "__main__":
    key = jax.random.PRNGKey(0)
    pkey, xkey = jax.random.split(key)
    params = init_params(pkey)

    # 8x8 spatial so that per-sample conv2 output is 32*2*2 == 128, i.e.
    # torch's .view(-1, 128) is exactly one row per sample.
    x = jax.random.normal(xkey, (2, 3, 8, 8), jnp.float32)  # NCHW

    folded = fold_params(params, in_hw=(8, 8))              # one-time fold
    fwd = jax.jit(fcnet_forward)

    # Tiny-batch path (single padded tile).
    z = fwd(x, folded)
    jax.block_until_ready(z)
    assert z.shape == (2, 2), z.shape
    z_ref = reference_forward(x, params)
    np.testing.assert_allclose(np.asarray(z), np.asarray(z_ref),
                               rtol=5e-2, atol=3e-2)        # bf16 operands

    # Multi-tile + padded-remainder path (N not a multiple of the tile).
    xb = jax.random.normal(jax.random.PRNGKey(1), (37, 3, 8, 8), jnp.float32)
    zb = fwd(xb, folded)
    jax.block_until_ready(zb)
    assert zb.shape == (37, 2), zb.shape
    np.testing.assert_allclose(np.asarray(zb),
                               np.asarray(reference_forward(xb, params)),
                               rtol=5e-2, atol=3e-2)

    # Parameter-point-batched path (loss-landscape sweep: P points, tiny N).
    pts = [init_params(jax.random.PRNGKey(10 + p)) for p in range(3)]
    stacks = [fold_params(p) for p in pts]
    folded_stack = tuple(jnp.stack([s[j] for s in stacks]) for j in range(3))
    zp = jax.jit(fcnet_forward_points)(x, folded_stack)
    jax.block_until_ready(zp)
    assert zp.shape == (3, 2, 2), zp.shape
    for p in range(3):
        np.testing.assert_allclose(
            np.asarray(zp[p]), np.asarray(reference_forward(x, pts[p])),
            rtol=5e-2, atol=3e-2)

    print("KERNEL_OK")
</pallas_src>

<mosaic_0001>
module attributes {stable_mosaic.version = 11 : i64} {
  func.func @_fcnet_fused_kernel(%arg0: i32, %arg1: memref<8x192xbf16, #tpu.memory_space<vmem>>, %arg2: memref<192x256xbf16, #tpu.memory_space<vmem>>, %arg3: memref<256x128xbf16, #tpu.memory_space<vmem>>, %arg4: memref<128x2xbf16, #tpu.memory_space<vmem>>, %arg5: memref<8x2xf32, #tpu.memory_space<vmem>>) attributes {dimension_semantics = [#tpu.dimension_semantics<parallel>], iteration_bounds = array<i64: 1>, scalar_prefetch = 0 : i64, scratch_operands = 0 : i64, tpu.core_type = #tpu.core_type<tc>, window_params = [{transform_indices = @transform_0, window_bounds = array<i64: 8, 192>}, {pipeline_mode = #tpu.pipeline_mode<synchronous>, transform_indices = @transform_1, window_bounds = array<i64: 192, 256>}, {pipeline_mode = #tpu.pipeline_mode<synchronous>, transform_indices = @transform_2, window_bounds = array<i64: 256, 128>}, {pipeline_mode = #tpu.pipeline_mode<synchronous>, transform_indices = @transform_3, window_bounds = array<i64: 128, 2>}, {transform_indices = @transform_4, window_bounds = array<i64: 8, 2>}]} {
    %c0 = arith.constant 0 : index
    %c0_0 = arith.constant 0 : index
    %0 = vector.load %arg1[%c0, %c0_0] : memref<8x192xbf16, #tpu.memory_space<vmem>>, vector<8x192xbf16>
    %c0_1 = arith.constant 0 : index
    %c0_2 = arith.constant 0 : index
    %1 = vector.load %arg2[%c0_1, %c0_2] : memref<192x256xbf16, #tpu.memory_space<vmem>>, vector<192x256xbf16>
    %cst = arith.constant dense<0.000000e+00> : vector<8x256xf32>
    %2 = tpu.matmul %0, %1, %cst {dimension_numbers = #tpu.dot_dimension_numbers<[1], [0], [0], [1], [0, 0, 1, 1], [], []>} : vector<8x192xbf16>, vector<192x256xbf16>, vector<8x256xf32> -> vector<8x256xf32>
    %cst_3 = arith.constant 0.000000e+00 : f32
    %3 = vector.broadcast %cst_3 : f32 to vector<8x256xf32>
    %4 = arith.maximumf %2, %3 : vector<8x256xf32>
    %5 = arith.truncf %4 : vector<8x256xf32> to vector<8x256xbf16>
    %c0_4 = arith.constant 0 : index
    %c0_5 = arith.constant 0 : index
    %6 = vector.load %arg3[%c0_4, %c0_5] : memref<256x128xbf16, #tpu.memory_space<vmem>>, vector<256x128xbf16>
    %cst_6 = arith.constant dense<0.000000e+00> : vector<8x128xf32>
    %7 = tpu.matmul %5, %6, %cst_6 {dimension_numbers = #tpu.dot_dimension_numbers<[1], [0], [0], [1], [0, 0, 1, 1], [], []>} : vector<8x256xbf16>, vector<256x128xbf16>, vector<8x128xf32> -> vector<8x128xf32>
    %cst_7 = arith.constant 0.000000e+00 : f32
    %8 = vector.broadcast %cst_7 : f32 to vector<8x128xf32>
    %9 = arith.maximumf %7, %8 : vector<8x128xf32>
    %10 = arith.truncf %9 : vector<8x128xf32> to vector<8x128xbf16>
    %c0_8 = arith.constant 0 : index
    %c0_9 = arith.constant 0 : index
    %11 = vector.load %arg4[%c0_8, %c0_9] : memref<128x2xbf16, #tpu.memory_space<vmem>>, vector<128x2xbf16>
    %cst_10 = arith.constant dense<0.000000e+00> : vector<8x2xf32>
    %12 = tpu.matmul %10, %11, %cst_10 {dimension_numbers = #tpu.dot_dimension_numbers<[1], [0], [0], [1], [0, 0, 1, 1], [], []>} : vector<8x128xbf16>, vector<128x2xbf16>, vector<8x2xf32> -> vector<8x2xf32>
    %c0_11 = arith.constant 0 : index
    %c0_12 = arith.constant 0 : index
    %13 = vector.load %arg5[%c0_11, %c0_12] : memref<8x2xf32, #tpu.memory_space<vmem>>, vector<8x2xf32>
    tpu.vector_store %arg5[%c0_11, %c0_12], %12 {strides = array<i32>} : memref<8x2xf32, #tpu.memory_space<vmem>>, vector<8x2xf32>,
    return
  }
  func.func @transform_0(%arg0: i32) -> (i32, i32) {
    %c0_i32 = arith.constant 0 : i32
    %c0_i32_0 = arith.constant 0 : i32
    return %arg0, %c0_i32 : i32, i32
  }
  func.func @transform_1(%arg0: i32) -> (i32, i32) {
    %c0_i32 = arith.constant 0 : i32
    %c0_i32_0 = arith.constant 0 : i32
    %c0_i32_1 = arith.constant 0 : i32
    return %c0_i32, %c0_i32_0 : i32, i32
  }
  func.func @transform_2(%arg0: i32) -> (i32, i32) {
    %c0_i32 = arith.constant 0 : i32
    %c0_i32_0 = arith.constant 0 : i32
    %c0_i32_1 = arith.constant 0 : i32
    return %c0_i32, %c0_i32_0 : i32, i32
  }
  func.func @transform_3(%arg0: i32) -> (i32, i32) {
    %c0_i32 = arith.constant 0 : i32
    %c0_i32_0 = arith.constant 0 : i32
    %c0_i32_1 = arith.constant 0 : i32
    return %c0_i32, %c0_i32_0 : i32, i32
  }
  func.func @transform_4(%arg0: i32) -> (i32, i32) {
    %c0_i32 = arith.constant 0 : i32
    %c0_i32_0 = arith.constant 0 : i32
    return %arg0, %c0_i32 : i32, i32
  }
}

</mosaic_0001>

<bundles_post_ra>
// kernel: fcnet_forward.1
= control target key start
LH: loop header
LB: loop body
LE: loop exit
PB: predicated region body
PF: predicated region fallthrough
CT: control target
= control target key end

     0   :  { %9 = vsyncpa [#allocation3], 0  ;;  %s706_s15 = smov [#allocation2]   ;;  %s826_s0 = inlined_call_operand.vmem [shape: bf16[8,192], index: 0, kind: input, shape index: {}]   ;;  %s827_s1 = inlined_call_operand.hbm [shape: bf16[192,256], index: 1, kind: input, shape index: {}]   ;;  %s828_s2 = inlined_call_operand.vmem [shape: bf16[256,128], index: 2, kind: input, shape index: {}]   ;;  %s829_s3 = inlined_call_operand.vmem [shape: bf16[128,2], index: 3, kind: input, shape index: {}]   ;;  %s830_s4 = inlined_call_operand.vmem [shape: f32[8,2], index: 4, kind: output, shape index: {}]  }
   0x1   :  { %s17_s16 = sshll.u32 %s706_s15, 4  ;;  %s682_s19 = scalar_lea.hbm %s827_s1, 3072  ;;  %s18_s16 = int_to_ptr.vmem [resolvable:$true] %s17_s16 }
   0x2   :  { %p683_p0 = scmp.ne.s32.totalorder %s827_s1, %s682_s19  ;;  %p686_p1 = scmp.lt.u32.totalorder %s682_s19, %s827_s1 }
   0x4   :  { %p688_p2 = pnand %p686_p1, %p683_p0 }
   0x6   :  { %691 = shalt.err (!%p688_p2)
}
   0x7   :  { %s692_s24 = scalar_lea.vmem %s18_s16, 3072  ;;  %p697_p4 = scmp.lt.s32.totalorder %s18_s16, %s18_s16 }
   0x8   :  { %p693_p3 = scmp.ne.s32.totalorder %s18_s16, %s692_s24  ;;  %p698_p5 = scmp.lt.s32.totalorder %s692_s24, %s692_s24 }
   0xa   :  { %p699_p6 = por %p698_p5, %p697_p4 }
   0xc   :  { %p700_p7 = pnand %p699_p6, %p693_p3 }
   0xe   :  { %703 = shalt.err (!%p700_p7)
}
   0xf   :  { %s707_s25 = smov 128   ;;  %s708_s26 = smov 8  }
  0x10   :  { %23 = dma.hbm_to_vmem [thread:$0]  %s827_s1, 3072, %s18_s16, [#allocation3], %s707_s25, %s707_s25, %s708_s26  }
  0x11   :  { %704 = dma.done.wait [#allocation3], 3072  }
  0x12   :  { %705 = vsyncadd [#allocation3], 4294964224  ;;  %v620_v0 = vld [vmem:[#allocation2 + $0x4] ss:$8 sps:$4 sm:$0xff]   ;;  %v622_v1 = vld [vmem:[#allocation2] ss:$8 sps:$4 sm:$0xff]  }
  0x13   :  { %187 = vmatprep.subr.bf16.mxu0 %v620_v0  ;;  %v623_v2 = vld [vmem:[#allocation2 + $0x14] ss:$8 sps:$4 sm:$0xff]   ;;  %v625_v3 = vld [vmem:[#allocation2 + $0x10] ss:$8 sps:$4 sm:$0xff]   ;;  %v626_v4 = vld [vmem:[#allocation2 + $0x24] ss:$8 sps:$4 sm:$0xff]  }
  0x14   :  { %188 = vmatpush1.bf16.msra.mxu0 %v622_v1  ;;  %v628_v5 = vld [vmem:[#allocation2 + $0x20] ss:$8 sps:$4 sm:$0xff]   ;;  %v629_v6 = vld [vmem:[#allocation2 + $0x34] ss:$8 sps:$4 sm:$0xff]   ;;  %v631_v7 = vld [vmem:[#allocation2 + $0x30] ss:$8 sps:$4 sm:$0xff]  }
  0x15   :  { %189 = vmatprep.subr.bf16.mxu0 %v623_v2  ;;  %v632_v8 = vld [vmem:[#allocation2 + $0x44] ss:$8 sps:$4 sm:$0xff]   ;;  %v634_v9 = vld [vmem:[#allocation2 + $0x40] ss:$8 sps:$4 sm:$0xff]   ;;  %v635_v10 = vld [vmem:[#allocation2 + $0x54] ss:$8 sps:$4 sm:$0xff]  }
  0x16   :  { %v32_v11 = vld [vmem:[%s826_s0] sm:$0xff]  ;;  %vm183_vm0 = vcmask 523264   ;;  %v637_v12 = vld [vmem:[#allocation2 + $0x50] ss:$8 sps:$4 sm:$0xff]   ;;  %v660_v16 = vld [vmem:[%s828_s2 + $0x48] sm:$0xff]   ;;  %v709_v43 = vmov 0.0  }
  0x17   :  { %v514_v13 = vcombine.high %v32_v11, %v32_v11  ;;  %v658_v14 = vld [vmem:[%s828_s2 + $0x40] sm:$0xff]   ;;  %v661_v18 = vld [vmem:[%s828_s2 + $0x8] sm:$0xff]   ;;  %v662_v19 = vld [vmem:[%s828_s2 + $0x50] sm:$0xff]   ;;  %v513_v39 = vcombine.low %v32_v11, %v32_v11  ;;  %vm710_vm1 = vmmov 0   ;;  %vm506_vm2 = vcmask 15360  }
  0x18   :  { %190 = vmatpush1.bf16.msra.mxu0 %v625_v3  ;;  %v659_v15 = vld [vmem:[%s828_s2] sm:$0xff]   ;;  %564 = vmatprep.subr.bf16.mxu1 %v658_v14  ;;  %v641_v21 = vld [vmem:[#allocation2 + $0x74] ss:$8 sps:$4 sm:$0xff]   ;;  %v643_v22 = vld [vmem:[#allocation2 + $0x70] ss:$8 sps:$4 sm:$0xff]  }
  0x19   :  { %191 = vmatprep.subr.bf16.mxu0 %v626_v4  ;;  %539 = vmatprep.mubr.msk.bf16.mxu0 %vm183_vm0, %v514_v13  ;;  %v638_v17 = vld [vmem:[#allocation2 + $0x64] ss:$8 sps:$4 sm:$0xff]   ;;  %v640_v20 = vld [vmem:[#allocation2 + $0x60] ss:$8 sps:$4 sm:$0xff]   ;;  %v663_v23 = vld [vmem:[%s828_s2 + $0x10] sm:$0xff]  }
  0x1a   :  { %565 = vmatpush3.bf16.msra.mxu1 %v659_v15  ;;  %v664_v24 = vld [vmem:[%s828_s2 + $0x58] sm:$0xff]   ;;  %v644_v25 = vld [vmem:[#allocation2 + $0x84] ss:$8 sps:$4 sm:$0xff]   ;;  %v646_v27 = vld [vmem:[#allocation2 + $0x80] ss:$8 sps:$4 sm:$0xff]  }
  0x1b   :  { %566 = vmatprep.subr.bf16.mxu1 %v660_v16  ;;  %v665_v26 = vld [vmem:[%s828_s2 + $0x18] sm:$0xff]   ;;  %v666_v28 = vld [vmem:[%s828_s2 + $0x60] sm:$0xff]   ;;  %v668_v31 = vld [vmem:[%s828_s2 + $0x68] sm:$0xff]  }
  0x1c   :  { %192 = vmatpush1.bf16.msra.mxu0 %v628_v5  ;;  %v647_v29 = vld [vmem:[#allocation2 + $0x94] ss:$8 sps:$4 sm:$0xff]   ;;  %v667_v30 = vld [vmem:[%s828_s2 + $0x20] sm:$0xff]   ;;  %v649_v32 = vld [vmem:[#allocation2 + $0x90] ss:$8 sps:$4 sm:$0xff]  }
  0x1d   :  { %193 = vmatprep.subr.bf16.mxu0 %v629_v6  ;;  %v650_v33 = vld [vmem:[#allocation2 + $0xa4] ss:$8 sps:$4 sm:$0xff]   ;;  %v670_v35 = vld [vmem:[%s828_s2 + $0x70] sm:$0xff]   ;;  %v652_v36 = vld [vmem:[#allocation2 + $0xa0] ss:$8 sps:$4 sm:$0xff]  }
  0x1e   :  { %567 = vmatpush3.bf16.msra.mxu1 %v661_v18  ;;  %v669_v34 = vld [vmem:[%s828_s2 + $0x28] sm:$0xff]   ;;  %v653_v37 = vld [vmem:[#allocation2 + $0xb4] ss:$8 sps:$4 sm:$0xff]   ;;  %v655_v38 = vld [vmem:[#allocation2 + $0xb0] ss:$8 sps:$4 sm:$0xff]  }
  0x1f   :  { %568 = vmatprep.subr.bf16.mxu1 %v662_v19  ;;  %v671_v40 = vld [vmem:[%s828_s2 + $0x30] sm:$0xff]   ;;  %v672_v41 = vld [vmem:[%s828_s2 + $0x78] sm:$0xff]   ;;  %v674_v51 = vld [vmem:[%s829_s3] sm:$0xff]  }
  0x20   :  { %194 = vmatpush1.bf16.msra.mxu0 %v631_v7  ;;  %v673_v42 = vld [vmem:[%s828_s2 + $0x38] sm:$0xff]   ;;  %v675_v53 = vld [vmem:[%s829_s3 + $0x8] sm:$0xff]   ;;  %v676_v54 = vld [vmem:[%s829_s3 + $0x10] sm:$0xff]  }
  0x21   :  { %195 = vmatprep.subr.bf16.mxu0 %v632_v8  ;;  %v677_v55 = vld [vmem:[%s829_s3 + $0x18] sm:$0xff]   ;;  %v678_v56 = vld [vmem:[%s829_s3 + $0x20] sm:$0xff]   ;;  %v679_v57 = vld [vmem:[%s829_s3 + $0x28] sm:$0xff]  }
  0x22   :  { %569 = vmatpush3.bf16.msra.mxu1 %v663_v23  ;;  %v680_v58 = vld [vmem:[%s829_s3 + $0x30] sm:$0xff]   ;;  %v681_v59 = vld [vmem:[%s829_s3 + $0x38] sm:$0xff]  }
  0x23   :  { %570 = vmatprep.subr.bf16.mxu1 %v664_v24 }
  0x24   :  { %196 = vmatpush1.bf16.msra.mxu0 %v634_v9 }
  0x25   :  { %197 = vmatprep.subr.bf16.mxu0 %v635_v10 }
  0x26   :  { %571 = vmatpush3.bf16.msra.mxu1 %v665_v26 }
  0x27   :  { %572 = vmatprep.subr.bf16.mxu1 %v666_v28 }
  0x28   :  { %198 = vmatpush1.bf16.msra.mxu0 %v637_v12 }
  0x29   :  { %199 = vmatprep.subr.bf16.mxu0 %v638_v17 }
  0x2a   :  { %573 = vmatpush3.bf16.msra.mxu1 %v667_v30 }
  0x2b   :  { %574 = vmatprep.subr.bf16.mxu1 %v668_v31 }
  0x2c   :  { %200 = vmatpush1.bf16.msra.mxu0 %v640_v20 }
  0x2d   :  { %201 = vmatprep.subr.bf16.mxu0 %v641_v21 }
  0x2e   :  { %575 = vmatpush3.bf16.msra.mxu1 %v669_v34 }
  0x2f   :  { %576 = vmatprep.subr.bf16.mxu1 %v670_v35 }
  0x30   :  { %202 = vmatpush1.bf16.msra.mxu0 %v643_v22 }
  0x31   :  { %203 = vmatprep.subr.bf16.mxu0 %v644_v25 }
  0x32   :  { %577 = vmatpush3.bf16.msra.mxu1 %v671_v40 }
  0x33   :  { %578 = vmatprep.subr.bf16.mxu1 %v672_v41 }
  0x34   :  { %204 = vmatpush1.bf16.msra.mxu0 %v646_v27 }
  0x35   :  { %205 = vmatprep.subr.bf16.mxu0 %v647_v29 }
  0x36   :  { %579 = vmatpush3.bf16.msra.mxu1 %v673_v42 }
  0x37   :  { %595 = vmatprep.subr.bf16.mxu1 %v709_v43 }
  0x38   :  { %206 = vmatpush1.bf16.msra.mxu0 %v649_v32 }
  0x39   :  { %207 = vmatprep.subr.bf16.mxu0 %v650_v33 }
  0x3c   :  { %208 = vmatpush1.bf16.msra.mxu0 %v652_v36 }
  0x3d   :  { %209 = vmatprep.subr.bf16.mxu0 %v653_v37 }
  0x40   :  { %210 = vmatpush1.bf16.msra.mxu0 %v655_v38 }
  0x43   :  { %220 = vmatmul.mubr.bf16.vlgmr.msra.gmra.mrb[0].mxu0 %v513_v39 }
 0x116   :  { %v221_v44 = vpop.f32.mrb[0].mxu0 }
 0x117   :  { %v228_v45 = vmax.f32 %v221_v44, 0.0  ;;  %v223_v46 = vpop.f32.mrb[1].mxu0 }
 0x118   :  { %v225_v47 = vpop.f32.mrb[2].mxu0  ;;  %v229_v48 = vmax.f32 %v223_v46, 0.0 }
 0x119   :  { %v226_v49 = vpop.f32.mrb[3].mxu0  ;;  %v230_v52 = vpack.c.bf16 %v228_v45, %v228_v45 }
 0x11a   :  { %v231_v50 = vpack.c.bf16 %v229_v48, %v229_v48 }
 0x11c   :  { %392 = vmatprep.mubr.bf16.mxu1 %v231_v50 }
 0x11d   :  { %393 = vmatmul.mubr.bf16.vlgmr.msra.gmra.mrb[0].mxu1 %v230_v52 }
 0x11e   :  { %596 = vmatpush3.bf16.msra.mxu1 %v674_v51  ;;  %611 = vmatprep.mubr.msk.bf16.mxu1 %vm710_vm1, %v709_v43 }
 0x11f   :  { %597 = vmatprep.subr.bf16.mxu1 %v709_v43 }
 0x122   :  { %598 = vmatpush3.bf16.msra.mxu1 %v675_v53 }
 0x123   :  { %599 = vmatprep.subr.bf16.mxu1 %v709_v43 }
 0x126   :  { %600 = vmatpush3.bf16.msra.mxu1 %v676_v54 }
 0x127   :  { %601 = vmatprep.subr.bf16.mxu1 %v709_v43 }
 0x12a   :  { %602 = vmatpush3.bf16.msra.mxu1 %v677_v55 }
 0x12b   :  { %603 = vmatprep.subr.bf16.mxu1 %v709_v43 }
 0x12e   :  { %604 = vmatpush3.bf16.msra.mxu1 %v678_v56 }
 0x12f   :  { %605 = vmatprep.subr.bf16.mxu1 %v709_v43 }
 0x132   :  { %606 = vmatpush3.bf16.msra.mxu1 %v679_v57 }
 0x133   :  { %607 = vmatprep.subr.bf16.mxu1 %v709_v43 }
 0x136   :  { %608 = vmatpush3.bf16.msra.mxu1 %v680_v58 }
 0x137   :  { %609 = vmatprep.subr.bf16.mxu1 %v709_v43 }
 0x13a   :  { %610 = vmatpush3.bf16.msra.mxu1 %v681_v59 }
 0x1f0   :  { %v580_v60 = vpop.f32.mrb[0].mxu1 }
 0x1f1   :  { %v581_v61 = vpop.f32.mrb[1].mxu1 }
 0x1f2   :  { %v582_v62 = vadd.f32 %v581_v61, %v580_v60  ;;  %v583_v63 = vpop.f32.mrb[2].mxu1 }
 0x1f3   :  { %v584_v0 = vpop.f32.mrb[3].mxu1 }
 0x1f4   :  { %v400_v1 = vmax.f32 %v582_v62, 0.0 }
 0x1f6   :  { %v401_v2 = vpack.c.bf16 %v400_v1, %v400_v1 }
 0x1f8   :  { %612 = vmatmul.mubr.bf16.vlgmr.msra.gmra.mrb[4].mxu1 %v401_v2 }
 0x2cb   :  { %v500_v3 = vpop.f32.mrb[4].mxu1 }
 0x2cc   :  { %507 = vst.msk [vmem:[%s830_s4] sm:$0xff] %vm506_vm2, %v500_v3  ;;  %v613_v4 = vpop.f32.mrb[5].mxu1 }
 0x2cd   :  { %v503_v5 = vpop.f32.mrb[6].mxu1 }
 0x2ce   :  { %v614_v6 = vpop.f32.mrb[7].mxu1 }
 0x2cf   :  { %512 = vsyncpa [#allocation3], 1 }

</bundles_post_ra>
